<compile_context>
chip_gen: v7x
topology: tpu7x:2x2x1
jax: 0.10.0
libtpu: 0.0.40
codegen_flags: <defaults>
</compile_context>

<pallas_src>
import math

import jax
import jax.numpy as jnp
from jax.experimental import pallas as pl
from jax.experimental.pallas import tpu as pltpu


def build_pe(channel: int, joint_num: int, time_len: int, domain: str) -> jnp.ndarray:
    """Deterministic buffer construction, mirroring the PyTorch __init__ exactly.

    Returns pe with shape (channel, time_len, joint_num) (the torch buffer minus
    its leading singleton batch dim).
    """
    t_idx = jnp.arange(time_len, dtype=jnp.float32)
    j_idx = jnp.arange(joint_num, dtype=jnp.float32)
    if domain == "temporal":
        # pos_list[t*joint_num + j] = t
        position = jnp.repeat(t_idx, joint_num)
    elif domain == "spatial":
        # pos_list[t*joint_num + j] = j
        position = jnp.tile(j_idx, time_len)
    else:
        raise ValueError(f"unknown domain: {domain}")
    position = position[:, None]  # (time_len*joint_num, 1)

    div_term = jnp.exp(
        jnp.arange(0, channel, 2, dtype=jnp.float32) * -(math.log(10000.0) / channel)
    )  # (ceil(channel/2),)

    sin_part = jnp.sin(position * div_term)
    cos_part = jnp.cos(position * div_term)

    pe = jnp.zeros((time_len * joint_num, channel), dtype=jnp.float32)
    pe = pe.at[:, 0::2].set(sin_part)
    pe = pe.at[:, 1::2].set(cos_part)

    # view(T, J, C).permute(2, 0, 1) -> (C, T, J)
    pe = pe.reshape(time_len, joint_num, channel).transpose(2, 0, 1)
    return pe


def _add_pe_kernel(x_ref, pe_ref, o_ref):
    # Layout A: x/pe/out are all (tc, L).  Layout B: x/out are (bn, tm) and
    # pe is (1, tm) (broadcast along sublanes).  pe is f32, so the add runs in
    # f32 and is rounded once at the store.
    o_ref[...] = (x_ref[...] + pe_ref[...]).astype(o_ref.dtype)


def _vmem_budget():
    """Return (vmem_limit_bytes, usable_block_budget) for the local chip."""
    try:
        cap = int(getattr(pltpu.get_tpu_info(), "vmem_capacity_bytes",
                          64 * 1024 * 1024))
    except Exception:  # best-effort query; fall back to conservative defaults
        cap = 64 * 1024 * 1024
    # Leave half of physical VMEM to the compiler / neighboring fusions; never
    # request more than 64 MiB.  v7x (64 MiB/TC) -> 32 MiB, v5e/v6e -> 64 MiB.
    limit = min(64 * 1024 * 1024, cap // 2)
    # Keep the double-buffered working set (2x x-in + 2x out + 2x pe) at ~75%
    # of the scoped limit: ~4 MiB x-blocks on v7x, ~8 MiB on v5e/v6e.
    budget = int(limit * 0.75)
    return limit, budget


def _pick_c_tile(c: int, L: int, x_itemsize: int, sublane_mult: int,
                 budget: int) -> int:
    """Largest channel tile whose full pipeline working set fits the budget."""
    # VMEM bytes per channel row across all buffers:
    # 2 buffers x-in + 2 buffers out (x dtype) + 2 buffers pe (f32).
    per_row = L * (4 * x_itemsize + 2 * 4)
    tc = budget // max(per_row, 1)
    if tc >= c:
        return c
    return min(c, max(sublane_mult, (tc // sublane_mult) * sublane_mult))


def positional_encoding_forward(x: jnp.ndarray, pe: jnp.ndarray,
                                *, donate_x: bool = False) -> jnp.ndarray:
    """x: (N, C, T, J); pe: (C, time_len, J). Returns x + pe[None, :, :T, :].

    Set donate_x=True only when the caller actually donates x (e.g. under jit
    with donate_argnums): it adds input_output_aliases so the output reuses x's
    HBM buffer.  In eager mode aliasing a non-donated input would force XLA to
    copy x first, so it is OFF by default.
    """
    n, c, t, j = x.shape
    c_pe, time_len, j_pe = pe.shape
    assert c_pe == c and j_pe == j and t <= time_len

    itemsize = x.dtype.itemsize
    sublane_mult = 8 * max(1, 4 // itemsize)  # 8 f32, 16 bf16/fp16, 32 int8/fp8
    vmem_limit, budget = _vmem_budget()

    # Keep pe in f32 (do NOT downcast to x.dtype): add in f32, round once.
    pe_sl = pe if t == time_len else pe[:, :t, :]
    pe_sl = pe_sl.astype(jnp.float32)

    L = t * j
    if L >= 128:
        # ---- Layout A: (N, C, L) with channel tiles, batch innermost. -------
        x2 = x.reshape(n, c, L)
        pe2 = pe_sl.reshape(c, L)

        tc = _pick_c_tile(c, L, itemsize, sublane_mult, budget)
        num_c = pl.cdiv(c, tc)
        # v7x megacore: expose >= 2 grid steps along a parallel axis if we can.
        if num_c * n < 2 and c >= 2 * sublane_mult:
            tc = max(sublane_mult, ((c // 2) // sublane_mult) * sublane_mult)
            num_c = pl.cdiv(c, tc)
        # NOTE: if C < sublane_mult (tiny demo shapes) the tile is sublane-
        # sparse; functionally fine and irrelevant at such sizes.

        grid = (num_c, n)
        in_specs = [
            # `None` squeezes the batch dim: the kernel sees a plain (tc, L)
            # ref, so the add has no leading-1 broadcast.
            pl.BlockSpec((None, tc, L), lambda ci, b: (b, ci, 0)),
            # pe's block index is constant across the inner batch axis -> its
            # DMA is elided (read once per C tile, not N times).
            # TODO(synk): pe could be single-buffered (pl.Buffered(1)) to save
            # one block of VMEM; deferred — its extra buffer is already
            # accounted for in the budget and the DMA is already elided.
            pl.BlockSpec((tc, L), lambda ci, b: (ci, 0)),
        ]
        out_spec = pl.BlockSpec((None, tc, L), lambda ci, b: (b, ci, 0))
        out_shape = jax.ShapeDtypeStruct((n, c, L), x.dtype)
        flops = n * c * L
        bytes_accessed = 2 * n * c * L * itemsize + c * L * 4
        operands = (x2, pe2)
    else:
        # ---- Layout B: T*J < 128 would leave most lanes masked; flatten the
        # whole per-batch (C, T, J) volume into one lane-dense axis. ----------
        M = c * L
        x2 = x.reshape(n, M)
        pe2 = pe_sl.reshape(1, M)

        bn = n if n < 8 else 8
        per_col = bn * 4 * itemsize + 2 * 4  # 2x x-in + 2x out + 2x pe(f32)
        tm = budget // max(per_col, 1)
        if tm < M:
            tm = max(128, (tm // 128) * 128)
        tm = min(tm, M)
        num_m = pl.cdiv(M, tm)
        num_b = pl.cdiv(n, bn)
        if num_m * num_b < 2 and tm >= 256:  # megacore exposure on v7x
            tm = max(128, ((tm // 2) // 128) * 128)
            num_m = pl.cdiv(M, tm)

        grid = (num_m, num_b)
        in_specs = [
            pl.BlockSpec((bn, tm), lambda mi, bi: (bi, mi)),
            # pe's block index is constant across the inner batch-tile axis.
            pl.BlockSpec((1, tm), lambda mi, bi: (0, mi)),
        ]
        out_spec = pl.BlockSpec((bn, tm), lambda mi, bi: (bi, mi))
        out_shape = jax.ShapeDtypeStruct((n, M), x.dtype)
        flops = n * M
        bytes_accessed = 2 * n * M * itemsize + M * 4
        operands = (x2, pe2)

    extra_kwargs = {}
    if donate_x:
        extra_kwargs["input_output_aliases"] = {0: 0}

    out = pl.pallas_call(
        _add_pe_kernel,
        out_shape=out_shape,
        grid=grid,
        in_specs=in_specs,
        out_specs=out_spec,
        compiler_params=pltpu.CompilerParams(
            dimension_semantics=("parallel", "parallel"),
            vmem_limit_bytes=vmem_limit,
        ),
        cost_estimate=pl.CostEstimate(
            flops=flops, transcendentals=0, bytes_accessed=bytes_accessed),
        **extra_kwargs,
    )(*operands)

    return out.reshape(n, c, t, j)


if __name__ == "__main__":
    key = jax.random.PRNGKey(0)

    # Case 1 (primary layout A, L = T*J = 256 >= 128):
    # batch=2, channel=4, time_len=16, joint_num=16, spatial domain.
    N, C, T_LEN, J_NUM = 2, 4, 16, 16
    x = jax.random.normal(key, (N, C, T_LEN, J_NUM), dtype=jnp.float32)
    pe = build_pe(C, J_NUM, T_LEN, "spatial")
    out = jax.block_until_ready(positional_encoding_forward(x, pe))
    ref = x + pe[None, :, : x.shape[2], :]
    assert out.shape == x.shape
    assert jnp.allclose(out, ref, atol=1e-6), "layout A mismatch vs reference"

    # Case 2 (small-L fallback layout B, L = T*J = 64 < 128):
    # batch=2, channel=32, time_len=8, joint_num=8, temporal domain.
    key2 = jax.random.fold_in(key, 1)
    N2, C2, T_LEN2, J_NUM2 = 2, 32, 8, 8
    x_b = jax.random.normal(key2, (N2, C2, T_LEN2, J_NUM2), dtype=jnp.float32)
    pe_b = build_pe(C2, J_NUM2, T_LEN2, "temporal")
    out_b = jax.block_until_ready(positional_encoding_forward(x_b, pe_b))
    ref_b = x_b + pe_b[None, :, : x_b.shape[2], :]
    assert out_b.shape == x_b.shape
    assert jnp.allclose(out_b, ref_b, atol=1e-6), "layout B mismatch vs reference"

    print("KERNEL_OK")
</pallas_src>

<mosaic_0001>
module attributes {stable_mosaic.version = 11 : i64} {
  func.func @_add_pe_kernel(%arg0: i32, %arg1: i32, %arg2: memref<1x4x256xf32, #tpu.memory_space<vmem>>, %arg3: memref<4x256xf32, #tpu.memory_space<vmem>>, %arg4: memref<1x4x256xf32, #tpu.memory_space<vmem>>) attributes {dimension_semantics = [#tpu.dimension_semantics<parallel>, #tpu.dimension_semantics<parallel>], iteration_bounds = array<i64: 1, 2>, scalar_prefetch = 0 : i64, scratch_operands = 0 : i64, tpu.core_type = #tpu.core_type<tc>, window_params = [{transform_indices = @transform_0, window_bounds = array<i64: 1, 4, 256>}, {transform_indices = @transform_1, window_bounds = array<i64: 4, 256>}, {transform_indices = @transform_2, window_bounds = array<i64: 1, 4, 256>}]} {
    %c0 = arith.constant 0 : index
    %c0_0 = arith.constant 0 : index
    %c0_1 = arith.constant 0 : index
    %0 = vector.load %arg2[%c0, %c0_0, %c0_1] : memref<1x4x256xf32, #tpu.memory_space<vmem>>, vector<1x4x256xf32>
    %1 = vector.shape_cast %0 : vector<1x4x256xf32> to vector<4x256xf32>
    %c0_2 = arith.constant 0 : index
    %c0_3 = arith.constant 0 : index
    %2 = vector.load %arg3[%c0_2, %c0_3] : memref<4x256xf32, #tpu.memory_space<vmem>>, vector<4x256xf32>
    %3 = arith.addf %1, %2 : vector<4x256xf32>
    %c0_4 = arith.constant 0 : index
    %c0_5 = arith.constant 0 : index
    %c0_6 = arith.constant 0 : index
    %4 = vector.load %arg4[%c0_4, %c0_5, %c0_6] : memref<1x4x256xf32, #tpu.memory_space<vmem>>, vector<1x4x256xf32>
    %5 = vector.shape_cast %4 : vector<1x4x256xf32> to vector<4x256xf32>
    %6 = vector.shape_cast %3 : vector<4x256xf32> to vector<1x4x256xf32>
    tpu.vector_store %arg4[%c0_4, %c0_5, %c0_6], %6 {strides = array<i32>} : memref<1x4x256xf32, #tpu.memory_space<vmem>>, vector<1x4x256xf32>,
    return
  }
  func.func @transform_0(%arg0: i32, %arg1: i32) -> (i32, i32, i32) {
    %c0_i32 = arith.constant 0 : i32
    %c0_i32_0 = arith.constant 0 : i32
    return %arg1, %arg0, %c0_i32 : i32, i32, i32
  }
  func.func @transform_1(%arg0: i32, %arg1: i32) -> (i32, i32) {
    %c0_i32 = arith.constant 0 : i32
    %c0_i32_0 = arith.constant 0 : i32
    return %arg0, %c0_i32 : i32, i32
  }
  func.func @transform_2(%arg0: i32, %arg1: i32) -> (i32, i32, i32) {
    %c0_i32 = arith.constant 0 : i32
    %c0_i32_0 = arith.constant 0 : i32
    return %arg1, %arg0, %c0_i32 : i32, i32, i32
  }
}

</mosaic_0001>

<bundles_post_ra>
// kernel: tpu_custom_call.1
= control target key start
LH: loop header
LB: loop body
LE: loop exit
PB: predicated region body
PF: predicated region fallthrough
CT: control target
= control target key end

     0   :  { %7 = vsyncpa [#allocation3], 0  ;;  %s788_s0 = inlined_call_operand.hbm [shape: f32[2,4,256], index: 0, kind: input, shape index: {}]   ;;  %s789_s1 = inlined_call_operand.hbm [shape: f32[4,256], index: 1, kind: input, shape index: {}]   ;;  %s790_s2 = inlined_call_operand.hbm [shape: f32[2,4,256], index: 2, kind: output, shape index: {}]  }
   0x1   :  { %9 = vsyncpa [#allocation3 + $0x1], 0 }
   0x2   :  { %10 = vsyncpa [#allocation6], 0 }
   0x3   :  { %11 = vsyncpa [#allocation4], 0 }
   0x4   :  { %13 = vsyncpa [#allocation4 + $0x1], 0  ;;  %s572_s9 = smov 0   ;;  %s574_s10 = smov 0  }
   0x5   :  { %s576_s11 = smov 0   ;;  %s578_s12 = smov 0  }
   0x6   :  { %s580_s13 = smov 0   ;;  %s582_s14 = smov 0  }
   0x7 LB: > { %s316_s15 = sadd.s32 4294967295, %s552_s14   ;;  %s317_s16 = sadd.s32 4294967294, %s552_s14   ;;  %s552_s14 = sphi %s582_s14, %s19_s14   ;;  %s548_s13 = sphi %s580_s13, %s815_s13   ;;  %s544_s12 = sphi %s578_s12, %s814_s12   ;;  %s540_s11 = sphi %s576_s11, %s813_s11   ;;  %s536_s10 = sphi %s574_s10, %s812_s10   ;;  %s532_s9 = sphi %s572_s9, %s811_s9  }
   0x8   : > { %p53_p0 = scmp.ne.s32.totalorder %s536_s10, %s532_s9  ;;  %p606_p1 = scmp.eq.s32.totalorder %s316_s15, 0 }
   0x9   : > { %p610_p2 = scmp.eq.s32.totalorder %s316_s15, 1  ;;  %p111_p3 = scmp.eq.s32.totalorder %s317_s16, 1 }
   0xa   : > { %s795_s17 = scalar_select %p606_p1, 1, 0 }
   0xb   : > { %s796_s18 = scalar_select %p610_p2, 1, 0 }
   0xc   : > { %p616_p4 = por %p606_p1, %p53_p0  ;;  %p318_p5 = scmp.ge.s32.totalorder %s552_s14, 1 }
   0xd   : > { %p621_p6 = por %p111_p3, %p53_p0  ;;  %p118_p7 = scmp.lt.s32.totalorder %s552_s14, 3 }
   0xe   : > { %s797_s19 = scalar_select %p616_p4, 1, 0 }
   0xf   : > { %s798_s20 = scalar_select %p621_p6, 1, 0 }
  0x10   : > { %p626_p8 = pnand %p318_p5, %p118_p7  ;;  %s554_s22 = smov [#allocation5]  }
  0x11   : > { %s134_s23 = sshll.u32 %s554_s22, 4  ;;  %s28_s25 = sadd.s32 1, %s548_s13  ;;  %s135_s23 = int_to_ptr.vmem [resolvable:$true] %s134_s23 }
  0x12   : > { %s799_s21 = scalar_select %p626_p8, 1, 0 }
  0x13   : > { %p343_p10 = pneg %p626_p8  ;;  %s40_s26 = sadd.s32 1, %s540_s11 }
  0x14   : > { %p641_p12 = scmp.ge.s32.totalorder %s28_s25, 2  ;;  %s408_s30 = scalar_lea.hbm %s789_s1, 128 }
  0x15   : > { %p635_p11 = pnand %p343_p10, %p606_p1  ;;  %p409_p13 = scmp.ne.s32.totalorder %s789_s1, %s408_s30 }
  0x16   : > { %s801_s27 = scalar_select %p641_p12, 1, 0 }
  0x17   : > { %p410_p0 = pneg %p635_p11  ;;  %p415_p7 = scmp.lt.u32.totalorder %s408_s30, %s789_s1 }
  0x19   : > { %p411_p3 = pnand %p410_p0, %p409_p13 }
  0x1b   : > { %p412_p5 = pneg %p411_p3 }
  0x1d   : > { %p417_p10 = pnand %p415_p7, %p412_p5 }
  0x1f   : > { %420 = shalt.err (!%p417_p10)
}
  0x20   : > { %s421_s7 = scalar_lea.vmem %s135_s23, 128  ;;  %p429_p4 = scmp.lt.s32.totalorder %s135_s23, %s135_s23 }
  0x21   : > { %p422_p9 = scmp.ne.s32.totalorder %s135_s23, %s421_s7  ;;  %p430_p8 = scmp.lt.s32.totalorder %s421_s7, %s421_s7 }
  0x23   : > { %p424_p6 = pnand %p422_p9, %p410_p0  ;;  %p431_p2 = por %p430_p8, %p429_p4 }
  0x25   : > { %p425_p1 = pneg %p424_p6 }
  0x27   : > { %p432_p12 = pnand %p431_p2, %p425_p1 }
  0x29   : > { %435 = shalt.err (!%p432_p12)
}
  0x2a   : > { %346 = dma.hbm_to_vmem [thread:$0]  (!%p635_p11), %s789_s1, 128, %s135_s23, [#allocation6]  }
  0x2b   : > { %p802_p4 = scmp.ne.s32.totalorder %s801_s27, 0  ;;  %p47_p1 = scmp.ne.s32.totalorder %s540_s11, %s536_s10 }
  0x2c   : > { %p48_p2 = scmp.eq.s32.totalorder %s552_s14, 0  ;;  %p356_p6 = scmp.lt.s32.totalorder %s552_s14, 2 }
  0x2d   : > { %s817_s25 = smov (%p802_p4, %s28_s25), 0  ;;  %p803_p12 = scmp.ne.s32.totalorder %s796_s18, 0 }
  0x2e   : > { %s35_s16 = ssub.s32 %s548_s13, %s817_s25  ;;  %p49_p9 = por %p48_p2, %p47_p1 }
  0x2f   : > { %p38_p8 = scmp.eq.s32.totalorder %s35_s16, 0  ;;  %p673_p13 = por %p803_p12, %p47_p1 }
  0x30   : > { %s145_s24 = sand.u32 1, %s540_s11   ;;  %s333_s27 = sshll.u32 %s548_s13, 7 }
  0x31   : > { %s681_s28 = scalar_select %p38_p8, %s540_s11, %s40_s26  }
  0x32   : > { %s321_s23 = sshll.u32 %s145_s24, 3  ;;  %s687_s3 = scalar_lea.hbm %s788_s0, %s333_s27 }
  0x33   : > { %s149_s18 = scalar_lea.vmem [#allocation2], %s321_s23  ;;  %p691_p11 = pnand %p356_p6, %p49_p9 }
  0x34   : > { %s159_s4 = sshll.u32 %s149_s18, 4  ;;  %s146_s26 = scalar_lea.sflag [#allocation3], %s145_s24  ;;  %s689_s4 = int_to_ptr.vmem [resolvable:$true] %s159_s4 }
  0x35   : > { %s436_s6 = scalar_lea.hbm %s687_s3, 128  ;;  %p438_p3 = pneg %p691_p11 }
  0x36   : > { %p437_p0 = scmp.ne.s32.totalorder %s687_s3, %s436_s6  ;;  %s441_s15 = scalar_lea.hbm %s788_s0, 256 }
  0x37   : > { %p442_p10 = scmp.lt.u32.totalorder %s687_s3, %s788_s0  ;;  %p443_p4 = scmp.lt.u32.totalorder %s441_s15, %s436_s6 }
  0x38   : > { %p439_p5 = pnand %p438_p3, %p437_p0  ;;  %p445_p2 = scmp.lt.u32.totalorder %s436_s6, %s687_s3 }
  0x39   : > { %p444_p1 = por %p443_p4, %p442_p10 }
  0x3a   : > { %p440_p7 = pneg %p439_p5 }
  0x3b   : > { %p446_p6 = por %p445_p2, %p444_p1 }
  0x3d   : > { %p447_p8 = pnand %p446_p6, %p440_p7 }
  0x3f   : > { %450 = shalt.err (!%p447_p8)
}
  0x40   : > { %s451_s24 = scalar_lea.vmem %s689_s4, 128  ;;  %s555_s27 = smov [#allocation2]  }
  0x41   : > { %p452_p9 = scmp.ne.s32.totalorder %s689_s4, %s451_s24  ;;  %s456_s29 = sshll.u32 %s555_s27, 4  ;;  %s457_s29 = int_to_ptr.vmem [resolvable:$false] %s456_s29 }
  0x42   : > { %s458_s30 = scalar_lea.vmem %s457_s29, 256  ;;  %p459_p5 = scmp.lt.s32.totalorder %s689_s4, %s457_s29 }
  0x43   : > { %p454_p12 = pnand %p452_p9, %p438_p3  ;;  %p460_p10 = scmp.lt.s32.totalorder %s458_s30, %s451_s24 }
  0x45   : > { %p455_p0 = pneg %p454_p12  ;;  %p461_p4 = por %p460_p10, %p459_p5 }
  0x47   : > { %p462_p1 = pnand %p461_p4, %p455_p0 }
  0x49   : > { %465 = shalt.err (!%p462_p1)
}
  0x4a   : > { %350 = dma.hbm_to_vmem [thread:$0]  (!%p691_p11), %s687_s3, 128, %s689_s4, %s146_s26  }
  0x4b   : > { %p806_p7 = scmp.ne.s32.totalorder %s799_s21, 0 }
  0x4c   : > { %s723_s18 = sand.u32 (!%p806_p7), 1, %s536_s10   ;;  %p807_p3 = scmp.ne.s32.totalorder (!%p806_p7), %s797_s19, 0 }
  0x4d   : > { %168 = sbr.rel (%p806_p7) target bundleno = 113 (0x71), region = 28  ;;  %s325_s6 = sshll.u32 (!%p806_p7), %s723_s18, 3 }
  0x4e   : > { %s171_s7 = scalar_lea.sflag (!%p806_p7), [#allocation3], %s723_s18  ;;  %s174_s8 = scalar_lea.vmem (!%p806_p7), [#allocation2], %s325_s6 }
  0x54   : > { %519 = dma.done.wait (%p807_p3), %s171_s7, 128  }
  0x55   : > { %521 = vsyncadd (%p807_p3), %s171_s7, 4294967168  ;;  %p808_p2 = scmp.ne.s32.totalorder %s795_s17, 0 }
  0x57   : > { %523 = dma.done.wait (%p808_p2), [#allocation6], 128  }
  0x58   : > { %525 = vsyncadd (%p808_p2), [#allocation6], 4294967168  ;;  %s198_s21 = scalar_lea.vmem [#allocation7], %s325_s6  ;;  %s334_s4 = sshll.u32 %s544_s12, 7  ;;  %v199_v0 = vld [vmem:[%s174_s8] sm:$0xff]  ;;  %v200_v1 = vld [vmem:[#allocation5] sm:$0xff] }
  0x59   : > { %s220_s3 = sshll.u32 %s198_s21, 4  ;;  %v201_v2 = vadd.f32 %v200_v1, %v199_v0  ;;  %s741_s26 = scalar_lea.hbm %s790_s2, %s334_s4  ;;  %s736_s3 = int_to_ptr.vmem [resolvable:$true] %s220_s3 }
  0x5a   : > { %s204_s17 = scalar_lea.sflag [#allocation4], %s723_s18  ;;  %s466_s15 = scalar_lea.vmem %s736_s3, 128 }
  0x5b   : > { %202 = vst [vmem:[%s198_s21] sm:$0xff] %v201_v2  ;;  %p467_p11 = scmp.ne.s32.totalorder %s736_s3, %s466_s15  ;;  %s556_s12 = smov [#allocation7]  }
  0x5c   : > { %s470_s16 = sshll.u32 %s556_s12, 4  ;;  %s471_s16 = int_to_ptr.vmem [resolvable:$false] %s470_s16 }
  0x5d   : > { %p468_p6 = pnand %p467_p11, %p673_p13  ;;  %s472_s23 = scalar_lea.vmem %s471_s16, 256 }
  0x5e   : > { %p473_p9 = scmp.lt.s32.totalorder %s736_s3, %s471_s16  ;;  %p474_p12 = scmp.lt.s32.totalorder %s472_s23, %s466_s15 }
  0x5f   : > { %p469_p8 = pneg %p468_p6 }
  0x60   : > { %p475_p0 = por %p474_p12, %p473_p9 }
  0x62   : > { %p476_p5 = pnand %p475_p0, %p469_p8 }
  0x64   : > { %479 = shalt.err (!%p476_p5)
}
  0x65   : > { %s480_s24 = scalar_lea.hbm %s741_s26, 128  ;;  %s484_s30 = scalar_lea.hbm %s790_s2, 256 }
  0x66   : > { %p481_p10 = scmp.ne.s32.totalorder %s741_s26, %s480_s24  ;;  %p485_p7 = scmp.lt.u32.totalorder %s741_s26, %s790_s2 }
  0x67   : > { %p486_p3 = scmp.lt.u32.totalorder %s484_s30, %s480_s24  ;;  %p488_p11 = scmp.lt.u32.totalorder %s480_s24, %s741_s26 }
  0x68   : > { %p482_p4 = pnand %p481_p10, %p673_p13 }
  0x69   : > { %p487_p2 = por %p486_p3, %p485_p7 }
  0x6a   : > { %p483_p1 = pneg %p482_p4 }
  0x6b   : > { %p489_p6 = por %p488_p11, %p487_p2 }
  0x6d   : > { %p490_p8 = pnand %p489_p6, %p483_p1 }
  0x6f   : > { %493 = shalt.err (!%p490_p8)
}
  0x70   : > { %341 = dma.vmem_to_hbm [thread:$0]  (%p673_p13), %s736_s3, 128, %s741_s26, %s204_s17  }
  0x71 PF: > { %s232_s7 = sand.u32 1, %s532_s9   ;;  %p809_p9 = scmp.ne.s32.totalorder %s798_s20, 0 }
  0x72   : > { %p810_p12 = scmp.ge.s32.totalorder %s552_s14, 2  ;;  %s233_s8 = scalar_lea.sflag [#allocation4], %s232_s7 }
  0x74   : > { %p352_p0 = pnand %p810_p12, %p809_p9 }
  0x76   : > { %527 = dma.done.wait (!%p352_p0), %s233_s8, 128  }
  0x77   : > { %529 = vsyncadd (!%p352_p0), %s233_s8, 4294967168  ;;  %s19_s14 = sadd.s32 1, %s552_s14   ;;  %s811_s9 = smov %s536_s10 }
  0x78   : > { %p16_p5 = scmp.ge.s32.totalorder %s19_s14, 4   ;;  %s812_s10 = smov %s540_s11 }
  0x79   : > { %s813_s11 = smov %s681_s28  ;;  %s814_s12 = smov %s548_s13 }
  0x7a   : > { %s815_s13 = smov %s817_s25  ;;  %18 = sbr.rel (!%p16_p5) target bundleno = 7 (0x7), region = 78 }
  0x81   :  { %238 = vsyncpa [#allocation3], 1 }
  0x82   :  { %240 = vsyncpa [#allocation3 + $0x1], 1 }
  0x83   :  { %241 = vsyncpa [#allocation6], 1 }
  0x84   :  { %242 = vsyncpa [#allocation4], 1 }
  0x85   :  { %244 = vsyncpa [#allocation4 + $0x1], 1 }

</bundles_post_ra>
